<compile_context>
chip_gen: v6e
topology: v6e:2x2x1
jax: 0.10.0
libtpu: 0.0.40
codegen_flags: <defaults>
</compile_context>

<pallas_src>
import jax
import jax.numpy as jnp
import numpy as np
from jax import lax
from jax.experimental import pallas as pl
from jax.experimental.pallas import tpu as pltpu

B = 8          # batch
HIDDEN = 768   # hidden_state_size (fixed by the module spec)
VOCAB = 128    # vocab_size (constructor argument; small, lane-aligned)
HS1 = 128      # lin1 output width (module default hs1=128)


def _classifier_kernel(tk_ref,     # (B, 1)              int32 token ids
                       hs_ref,     # (B, HIDDEN)          f32 hidden states
                       w1_ref,     # (VOCAB+HIDDEN, HS1)  bf16 full lin1 weight
                       sp_ref,     # (3, HS1)             f32: [b1; w2^T; b2@[2,0]]
                       out_ref):   # (B, 1)               f32
    tk = tk_ref[...]                                             # (B, 1)

    # one_hot(tk) via lane-iota compare (vectorized, no gather / where+sum).
    vocab_ids = lax.broadcasted_iota(jnp.int32, (B, VOCAB), 1)   # (B, VOCAB)
    one_hot = (vocab_ids == tk).astype(jnp.bfloat16)             # (B, VOCAB)

    # Static, alignment-friendly in-kernel views of the single w1 operand.
    w1v = w1_ref[0:VOCAB, :]                                     # (VOCAB, HS1) bf16
    w1h = w1_ref[VOCAB:VOCAB + HIDDEN, :]                        # (HIDDEN, HS1) bf16

    b1 = sp_ref[0:1, :]                                          # (1, HS1)
    w2t = sp_ref[1:2, :]                                         # (1, HS1)
    b2 = sp_ref[2:3, 0:1]                                        # (1, 1)

    # lin1 on the [one_hot, hs0] concat, decomposed into two MXU matmuls,
    # f32 accumulation. hs0 kept f32 (accuracy); weights arrive bf16 (DMA).
    z = (jnp.dot(one_hot, w1v, preferred_element_type=jnp.float32)
         + jnp.dot(hs_ref[...], w1h.astype(jnp.float32),
                   preferred_element_type=jnp.float32)
         + b1)                                                   # (B, HS1)
    z = jnp.maximum(z, 0.0)                                      # ReLU

    # lin2 (HS1 -> 1): multiply + lane reduce instead of a 1-wide padded matmul.
    out_ref[...] = jnp.sum(z * w2t, axis=-1, keepdims=True) + b2  # (B, 1)


def prepare_params(params):
    """One-time (load-time) packing of module parameters into kernel operands.

    NOT done per forward call — the hot path passes exactly 4 operands with no
    wrapper-side slicing / copying of the weight matrix.
    """
    w1_b16 = params["w1"].astype(jnp.bfloat16)          # (VOCAB+HIDDEN, HS1)
    small = jnp.zeros((3, HS1), jnp.float32)
    small = small.at[0, :].set(params["b1"].reshape(HS1))
    small = small.at[1, :].set(params["w2"].reshape(HS1))
    small = small.at[2, 0].set(params["b2"].reshape(()))
    return w1_b16, small


@jax.jit
def classifier_forward(tk, hs0, w1_b16, small):
    """Pallas-backed forward matching Classifier.forward (returns shape (B,))."""
    vmem = pl.BlockSpec(memory_space=pltpu.MemorySpace.VMEM)
    out = pl.pallas_call(
        _classifier_kernel,
        out_shape=jax.ShapeDtypeStruct((B, 1), jnp.float32),
        in_specs=[vmem, vmem, vmem, vmem],
        out_specs=pl.BlockSpec(memory_space=pltpu.MemorySpace.VMEM),
    )(tk.astype(jnp.int32).reshape(B, 1),
      hs0.astype(jnp.float32),
      w1_b16,
      small)
    return out.reshape(B)


def ref_classifier(tk, hs0, params):
    """Pure-JAX reference mirroring the PyTorch module exactly (f32, HIGHEST)."""
    one_hot = jax.nn.one_hot(tk, VOCAB, dtype=jnp.float32)
    x = jnp.concatenate([one_hot, hs0.astype(jnp.float32)], axis=-1)
    z = jnp.maximum(
        jnp.dot(x, params["w1"], precision=lax.Precision.HIGHEST) + params["b1"], 0.0)
    out = jnp.dot(z, params["w2"], precision=lax.Precision.HIGHEST) + params["b2"]
    return out.reshape(-1)                  # squeeze(dim=-1)


def init_params(key):
    k1, k2 = jax.random.split(key)
    scale = 0.1
    return {
        "w1": scale * jax.random.normal(k1, (VOCAB + HIDDEN, HS1), jnp.float32),
        "b1": 0.01 * jnp.ones((HS1,), jnp.float32),
        "w2": scale * jax.random.normal(k2, (HS1, 1), jnp.float32),
        "b2": jnp.zeros((1,), jnp.float32),
    }


if __name__ == "__main__":
    key = jax.random.PRNGKey(0)
    k_param, k_tk, k_hs = jax.random.split(key, 3)
    params = init_params(k_param)
    w1_b16, small = prepare_params(params)   # one-time packing (load time)

    tk = jax.random.randint(k_tk, (B,), 0, VOCAB, dtype=jnp.int32)
    hs0 = jax.random.normal(k_hs, (B, HIDDEN), jnp.float32)

    out = classifier_forward(tk, hs0, w1_b16, small)
    out = jax.block_until_ready(out)

    ref = ref_classifier(tk, hs0, params)
    assert out.shape == (B,)
    # Tolerance relaxed vs the f32/HIGHEST reference because lin1 weights are
    # shipped in bf16 (f32 accumulation) — documented per the perf review.
    np.testing.assert_allclose(np.asarray(out), np.asarray(ref), rtol=5e-2, atol=5e-2)

    print("KERNEL_OK")
</pallas_src>

<mosaic_0001>
module attributes {stable_mosaic.version = 11 : i64} {
  func.func @_classifier_kernel(%arg0: memref<8x1xi32, #tpu.memory_space<vmem>>, %arg1: memref<8x768xf32, #tpu.memory_space<vmem>>, %arg2: memref<896x128xbf16, #tpu.memory_space<vmem>>, %arg3: memref<3x128xf32, #tpu.memory_space<vmem>>, %arg4: memref<8x1xf32, #tpu.memory_space<vmem>>) attributes {dimension_semantics = [], scalar_prefetch = 0 : i64, scratch_operands = 0 : i64, tpu.core_type = #tpu.core_type<tc>} {
    %c0 = arith.constant 0 : index
    %c0_0 = arith.constant 0 : index
    %0 = vector.load %arg0[%c0, %c0_0] : memref<8x1xi32, #tpu.memory_space<vmem>>, vector<8x1xi32>
    %1 = tpu.iota {dimensions = array<i32: 1>} : vector<8x128xi32>
    %2 = vector.broadcast %0 : vector<8x1xi32> to vector<8x128xi32>
    %3 = arith.cmpi eq, %1, %2 : vector<8x128xi32>
    %4 = arith.extui %3 : vector<8x128xi1> to vector<8x128xi32>
    %5 = arith.sitofp %4 : vector<8x128xi32> to vector<8x128xf32>
    %6 = arith.truncf %5 : vector<8x128xf32> to vector<8x128xbf16>
    %c0_1 = arith.constant 0 : index
    %c0_2 = arith.constant 0 : index
    %7 = vector.load %arg2[%c0_1, %c0_2] : memref<896x128xbf16, #tpu.memory_space<vmem>>, vector<128x128xbf16>
    %c128 = arith.constant 128 : index
    %c0_3 = arith.constant 0 : index
    %8 = vector.load %arg2[%c128, %c0_3] : memref<896x128xbf16, #tpu.memory_space<vmem>>, vector<768x128xbf16>
    %c0_4 = arith.constant 0 : index
    %c0_5 = arith.constant 0 : index
    %9 = vector.load %arg3[%c0_4, %c0_5] : memref<3x128xf32, #tpu.memory_space<vmem>>, vector<1x128xf32>
    %c1 = arith.constant 1 : index
    %c0_6 = arith.constant 0 : index
    %10 = vector.load %arg3[%c1, %c0_6] : memref<3x128xf32, #tpu.memory_space<vmem>>, vector<1x128xf32>
    %c2 = arith.constant 2 : index
    %c0_7 = arith.constant 0 : index
    %11 = vector.load %arg3[%c2, %c0_7] : memref<3x128xf32, #tpu.memory_space<vmem>>, vector<1x1xf32>
    %cst = arith.constant dense<0.000000e+00> : vector<8x128xf32>
    %12 = tpu.matmul %6, %7, %cst {dimension_numbers = #tpu.dot_dimension_numbers<[1], [0], [0], [1], [0, 0, 1, 1], [], []>} : vector<8x128xbf16>, vector<128x128xbf16>, vector<8x128xf32> -> vector<8x128xf32>
    %c0_8 = arith.constant 0 : index
    %c0_9 = arith.constant 0 : index
    %13 = vector.load %arg1[%c0_8, %c0_9] : memref<8x768xf32, #tpu.memory_space<vmem>>, vector<8x768xf32>
    %14 = arith.extf %8 : vector<768x128xbf16> to vector<768x128xf32>
    %cst_10 = arith.constant dense<0.000000e+00> : vector<8x128xf32>
    %15 = tpu.matmul %13, %14, %cst_10 {dimension_numbers = #tpu.dot_dimension_numbers<[1], [0], [0], [1], [0, 0, 1, 1], [], []>} : vector<8x768xf32>, vector<768x128xf32>, vector<8x128xf32> -> vector<8x128xf32>
    %16 = arith.addf %12, %15 : vector<8x128xf32>
    %17 = vector.broadcast %9 : vector<1x128xf32> to vector<8x128xf32>
    %18 = arith.addf %16, %17 : vector<8x128xf32>
    %cst_11 = arith.constant 0.000000e+00 : f32
    %19 = vector.broadcast %cst_11 : f32 to vector<8x128xf32>
    %20 = arith.maximumf %18, %19 : vector<8x128xf32>
    %21 = vector.broadcast %10 : vector<1x128xf32> to vector<8x128xf32>
    %22 = arith.mulf %20, %21 : vector<8x128xf32>
    %cst_12 = arith.constant dense<0.000000e+00> : vector<8xf32>
    %23 = vector.multi_reduction <add>, %22, %cst_12 [1] : vector<8x128xf32> to vector<8xf32>
    %24 = vector.shape_cast %23 : vector<8xf32> to vector<8x1xf32>
    %25 = vector.broadcast %11 : vector<1x1xf32> to vector<8x1xf32>
    %26 = arith.addf %24, %25 : vector<8x1xf32>
    %c0_13 = arith.constant 0 : index
    %c0_14 = arith.constant 0 : index
    %27 = vector.load %arg4[%c0_13, %c0_14] : memref<8x1xf32, #tpu.memory_space<vmem>>, vector<8x1xf32>
    tpu.vector_store %arg4[%c0_13, %c0_14], %26 {strides = array<i32>} : memref<8x1xf32, #tpu.memory_space<vmem>>, vector<8x1xf32>,
    return
  }
}

</mosaic_0001>

<bundles_post_ra>
// kernel: classifier_forward.1
= control target key start
LH: loop header
LB: loop body
LE: loop exit
PB: predicated region body
PF: predicated region fallthrough
CT: control target
= control target key end

     0   :  { %9 = vsyncpa [#allocation3], 0  ;;  %s1107_s0 = inlined_call_operand.vmem [shape: s32[8,1], index: 0, kind: input, shape index: {}]   ;;  %s1108_s1 = inlined_call_operand.hbm [shape: f32[8,768], index: 1, kind: input, shape index: {}]   ;;  %s1109_s2 = inlined_call_operand.hbm [shape: bf16[896,128], index: 2, kind: input, shape index: {}]   ;;  %s1110_s3 = inlined_call_operand.vmem [shape: f32[3,128], index: 3, kind: input, shape index: {}]   ;;  %s1111_s4 = inlined_call_operand.vmem [shape: f32[8,1], index: 4, kind: output, shape index: {}]  }
   0x1   :  { %10 = vsyncpa [#allocation5], 0  ;;  %s1044_s15 = smov [#allocation2]   ;;  %s1045_s17 = smov [#allocation4]  }
   0x2   :  { %s19_s16 = sshll.u32 %s1044_s15, 4  ;;  %s28_s18 = sshll.u32 %s1045_s17, 4  ;;  %s20_s16 = int_to_ptr.vmem [resolvable:$true] %s19_s16  ;;  %s29_s18 = int_to_ptr.vmem [resolvable:$true] %s28_s18 }
   0x3   :  { %s1008_s19 = scalar_lea.vmem %s20_s16, 768  ;;  %p1013_p1 = scmp.lt.s32.totalorder %s20_s16, %s20_s16 }
   0x4   :  { %p1009_p0 = scmp.ne.s32.totalorder %s20_s16, %s1008_s19  ;;  %p1014_p2 = scmp.lt.s32.totalorder %s1008_s19, %s1008_s19 }
   0x6   :  { %p1015_p3 = por %p1014_p2, %p1013_p1 }
   0x8   :  { %p1016_p4 = pnand %p1015_p3, %p1009_p0 }
   0xa   :  { %1019 = shalt.err (!%p1016_p4)
}
   0xb   :  { %22 = dma.hbm_to_vmem [thread:$0]  %s1108_s1, 768, %s20_s16, [#allocation3]  }
   0xc   :  { %s1028_s22 = scalar_lea.vmem %s29_s18, 7168  ;;  %p1033_p6 = scmp.lt.s32.totalorder %s29_s18, %s29_s18 }
   0xd   :  { %p1029_p5 = scmp.ne.s32.totalorder %s29_s18, %s1028_s22  ;;  %p1034_p7 = scmp.lt.s32.totalorder %s1028_s22, %s1028_s22 }
   0xf   :  { %p1035_p8 = por %p1034_p7, %p1033_p6 }
  0x11   :  { %p1036_p9 = pnand %p1035_p8, %p1029_p5 }
  0x13   :  { %1039 = shalt.err (!%p1036_p9)
}
  0x14   :  { %s1046_s23 = smov 64   ;;  %s1047_s24 = smov 4  }
  0x15   :  { %34 = dma.hbm_to_vmem [thread:$0]  %s1109_s2, 7168, %s29_s18, [#allocation5], %s1046_s23, %s1046_s23, %s1047_s24  }
  0x16   :  { %1040 = dma.done.wait [#allocation3], 768  }
  0x17   :  { %1041 = vsyncadd [#allocation3], 4294966528 }
  0x18   :  { %1042 = dma.done.wait [#allocation5], 7168  }
  0x19   :  { %1043 = vsyncadd [#allocation5], 4294960128  ;;  %v1048_v0 = vmov 0   ;;  %v44_v1 = vld [vmem:[%s1107_s0] sm:$0xff]  ;;  %v816_v2 = vld [vmem:[#allocation4 + $0xb8] sm:$0xff]   ;;  %vm1050_vm0 = vmmov 0  }
  0x1a   :  { %991 = vset.pattern.permute.xlu0 %v1048_v0  ;;  %v808_v3 = vld [vmem:[#allocation4 + $0x78] sm:$0xff]   ;;  %v671_v4 = vunpack.c.l.bf16 %v816_v2  ;;  %v672_v5 = vunpack.c.h.bf16 %v816_v2  ;;  %v815_v7 = vld [vmem:[#allocation4 + $0xb0] sm:$0xff]   ;;  %v814_v12 = vld [vmem:[#allocation4 + $0xa8] sm:$0xff]   ;;  %vm587_vm3 = vcmask 7168  }
  0x1b   :  { %48 = vperm.xlu0 %991, %v44_v1   ;;  %v640_v6 = vunpack.c.h.bf16 %v808_v3  ;;  %v807_v8 = vld [vmem:[#allocation4 + $0x70] sm:$0xff]   ;;  %v639_v9 = vunpack.c.l.bf16 %v808_v3  ;;  %v668_v10 = vunpack.c.h.bf16 %v815_v7  ;;  %v667_v13 = vunpack.c.l.bf16 %v815_v7  ;;  %v806_v14 = vld [vmem:[#allocation4 + $0x68] sm:$0xff]   ;;  %v832_v16 = vld [vmem:[#allocation4 + $0x138] sm:$0xff]  }
  0x1c   :  { %849 = vmatprep.subr.mxu0 %v672_v5  ;;  %v636_v11 = vunpack.c.h.bf16 %v807_v8  ;;  %v635_v15 = vunpack.c.l.bf16 %v807_v8  ;;  %v824_v17 = vld [vmem:[#allocation4 + $0xf8] sm:$0xff]   ;;  %v664_v19 = vunpack.c.h.bf16 %v814_v12  ;;  %v632_v20 = vunpack.c.h.bf16 %v806_v14  ;;  %v813_v21 = vld [vmem:[#allocation4 + $0xa0] sm:$0xff]   ;;  %v831_v22 = vld [vmem:[#allocation4 + $0x130] sm:$0xff]  }
  0x1d   :  { %850 = vmatpush3.msra.mxu0 %v640_v6  ;;  %v170_v18 = vld [vmem:[#allocation2 + $0x8] sm:$0xff]  ;;  %v663_v23 = vunpack.c.l.bf16 %v814_v12  ;;  %v805_v24 = vld [vmem:[#allocation4 + $0x60] sm:$0xff]   ;;  %v735_v25 = vunpack.c.l.bf16 %v832_v16  ;;  %v736_v26 = vunpack.c.h.bf16 %v832_v16  ;;  %v704_v27 = vunpack.c.h.bf16 %v824_v17  ;;  %v823_v28 = vld [vmem:[#allocation4 + $0xf0] sm:$0xff]  }
  0x1e   :  { %851 = vmatprep.subr.mxu0 %v671_v4  ;;  %335 = vmatprep.mubr.f32.mxu0 %v170_v18  ;;  %v631_v29 = vunpack.c.l.bf16 %v806_v14  ;;  %v703_v30 = vunpack.c.l.bf16 %v824_v17  ;;  %v660_v31 = vunpack.c.h.bf16 %v813_v21  ;;  %v732_v32 = vunpack.c.h.bf16 %v831_v22  ;;  %v812_v34 = vld [vmem:[#allocation4 + $0x98] sm:$0xff]   ;;  %v830_v36 = vld [vmem:[#allocation4 + $0x128] sm:$0xff]   ;;  %v811_v46 = vld [vmem:[#allocation4 + $0x90] sm:$0xff]  }
  0x1f   :  { %852 = vmatpush3.msra.mxu0 %v639_v9  ;;  %884 = vmatprep.subr.mxu1 %v736_v26  ;;  %v628_v33 = vunpack.c.h.bf16 %v805_v24  ;;  %v700_v35 = vunpack.c.h.bf16 %v823_v28  ;;  %v659_v37 = vunpack.c.l.bf16 %v813_v21  ;;  %v804_v38 = vld [vmem:[#allocation4 + $0x58] sm:$0xff]   ;;  %v731_v39 = vunpack.c.l.bf16 %v831_v22  ;;  %v822_v40 = vld [vmem:[#allocation4 + $0xe8] sm:$0xff]   ;;  %v829_v48 = vld [vmem:[#allocation4 + $0x120] sm:$0xff]  }
  0x20   :  { %853 = vmatprep.subr.mxu0 %v668_v10  ;;  %885 = vmatpush3.msra.mxu1 %v704_v27  ;;  %v627_v41 = vunpack.c.l.bf16 %v805_v24  ;;  %v699_v42 = vunpack.c.l.bf16 %v823_v28  ;;  %v656_v43 = vunpack.c.h.bf16 %v812_v34  ;;  %v728_v44 = vunpack.c.h.bf16 %v830_v36  ;;  %v803_v50 = vld [vmem:[#allocation4 + $0x50] sm:$0xff]   ;;  %v821_v52 = vld [vmem:[#allocation4 + $0xe0] sm:$0xff]   ;;  %v810_v54 = vld [vmem:[#allocation4 + $0x88] sm:$0xff]  }
  0x21   :  { %854 = vmatpush3.msra.mxu0 %v636_v11  ;;  %886 = vmatprep.subr.mxu1 %v735_v25  ;;  %v624_v45 = vunpack.c.h.bf16 %v804_v38  ;;  %v696_v47 = vunpack.c.h.bf16 %v822_v40  ;;  %v655_v49 = vunpack.c.l.bf16 %v812_v34  ;;  %v727_v51 = vunpack.c.l.bf16 %v830_v36  ;;  %v802_v57 = vld [vmem:[#allocation4 + $0x48] sm:$0xff]   ;;  %v828_v61 = vld [vmem:[#allocation4 + $0x118] sm:$0xff]   ;;  %v809_v2 = vld [vmem:[#allocation4 + $0x80] sm:$0xff]  }
  0x22   :  { %855 = vmatprep.subr.mxu0 %v667_v13  ;;  %887 = vmatpush3.msra.mxu1 %v703_v30  ;;  %v623_v53 = vunpack.c.l.bf16 %v804_v38  ;;  %v695_v55 = vunpack.c.l.bf16 %v822_v40  ;;  %v652_v56 = vunpack.c.h.bf16 %v811_v46  ;;  %v724_v58 = vunpack.c.h.bf16 %v829_v48  ;;  %v820_v0 = vld [vmem:[#allocation4 + $0xd8] sm:$0xff]   ;;  %v801_v5 = vld [vmem:[#allocation4 + $0x40] sm:$0xff]   ;;  %v827_v9 = vld [vmem:[#allocation4 + $0x110] sm:$0xff]  }
  0x23   :  { %856 = vmatpush3.msra.mxu0 %v635_v15  ;;  %888 = vmatprep.subr.mxu1 %v732_v32  ;;  %v620_v59 = vunpack.c.h.bf16 %v803_v50  ;;  %v692_v60 = vunpack.c.h.bf16 %v821_v52  ;;  %v651_v62 = vunpack.c.l.bf16 %v811_v46  ;;  %v723_v63 = vunpack.c.l.bf16 %v829_v48  ;;  %v819_v12 = vld [vmem:[#allocation4 + $0xd0] sm:$0xff]   ;;  %v848_v18 = vld [vmem:[#allocation4 + $0x1b8] sm:$0xff]   ;;  %v818_v26 = vld [vmem:[#allocation4 + $0xc8] sm:$0xff]  }
  0x24   :  { %857 = vmatprep.subr.mxu0 %v664_v19  ;;  %889 = vmatpush3.msra.mxu1 %v700_v35  ;;  %v619_v1 = vunpack.c.l.bf16 %v803_v50  ;;  %v691_v3 = vunpack.c.l.bf16 %v821_v52  ;;  %v648_v4 = vunpack.c.h.bf16 %v810_v54  ;;  %v720_v6 = vunpack.c.h.bf16 %v828_v61  ;;  %v840_v21 = vld [vmem:[#allocation4 + $0x178] sm:$0xff]   ;;  %v169_v28 = vld [vmem:[#allocation2] sm:$0xff]  ;;  %v825_v35 = vld [vmem:[#allocation4 + $0x100] sm:$0xff]  }
  0x25   :  { %858 = vmatpush3.msra.mxu0 %v632_v20  ;;  %890 = vmatprep.subr.mxu1 %v731_v39  ;;  %v616_v7 = vunpack.c.h.bf16 %v802_v57  ;;  %v688_v8 = vunpack.c.h.bf16 %v820_v0  ;;  %v647_v10 = vunpack.c.l.bf16 %v810_v54  ;;  %v719_v11 = vunpack.c.l.bf16 %v828_v61  ;;  %v847_v30 = vld [vmem:[#allocation4 + $0x1b0] sm:$0xff]   ;;  %v817_v38 = vld [vmem:[#allocation4 + $0xc0] sm:$0xff]   ;;  %v844_v61 = vld [vmem:[#allocation4 + $0x198] sm:$0xff]  }
  0x26   :  { %859 = vmatprep.subr.mxu0 %v663_v23  ;;  %891 = vmatpush3.msra.mxu1 %v699_v42  ;;  %v615_v13 = vunpack.c.l.bf16 %v802_v57  ;;  %v687_v14 = vunpack.c.l.bf16 %v820_v0  ;;  %v644_v15 = vunpack.c.h.bf16 %v809_v2  ;;  %v716_v16 = vunpack.c.h.bf16 %v827_v9  ;;  %v826_v23 = vld [vmem:[#allocation4 + $0x108] sm:$0xff]   ;;  %v845_v52 = vld [vmem:[#allocation4 + $0x1a0] sm:$0xff]   ;;  %v836_v0 = vld [vmem:[#allocation4 + $0x158] sm:$0xff]  }
  0x27   :  { %860 = vmatpush3.msra.mxu0 %v631_v29  ;;  %892 = vmatprep.subr.mxu1 %v728_v44  ;;  %v612_v17 = vunpack.c.h.bf16 %v801_v5  ;;  %v684_v19 = vunpack.c.h.bf16 %v819_v12  ;;  %v643_v20 = vunpack.c.l.bf16 %v809_v2  ;;  %v715_v22 = vunpack.c.l.bf16 %v827_v9  ;;  %v846_v42 = vld [vmem:[#allocation4 + $0x1a8] sm:$0xff]   ;;  %v837_v54 = vld [vmem:[#allocation4 + $0x160] sm:$0xff]  }
  0x28   :  { %861 = vmatprep.subr.mxu0 %v660_v31  ;;  %893 = vmatpush3.msra.mxu1 %v696_v47  ;;  %v611_v24 = vunpack.c.l.bf16 %v801_v5  ;;  %v683_v25 = vunpack.c.l.bf16 %v819_v12  ;;  %v800_v27 = vunpack.c.h.bf16 %v848_v18  ;;  %v768_v29 = vunpack.c.h.bf16 %v840_v21  ;;  %v171_v57 = vld [vmem:[#allocation2 + $0x10] sm:$0xff]  ;;  %v843_v5 = vld [vmem:[#allocation4 + $0x190] sm:$0xff]   ;;  %v842_v12 = vld [vmem:[#allocation4 + $0x188] sm:$0xff]  }
  0x29   :  { %862 = vmatpush3.msra.mxu0 %v628_v33  ;;  %894 = vmatprep.subr.mxu1 %v727_v51  ;;  %v712_v31 = vunpack.c.h.bf16 %v826_v23  ;;  %v799_v32 = vunpack.c.l.bf16 %v848_v18  ;;  %v839_v33 = vld [vmem:[#allocation4 + $0x170] sm:$0xff]   ;;  %v680_v34 = vunpack.c.h.bf16 %v818_v26  ;;  %v767_v36 = vunpack.c.l.bf16 %v840_v21 }
  0x2a   :  { %863 = vmatprep.subr.mxu0 %v659_v37  ;;  %895 = vmatpush3.msra.mxu1 %v695_v55  ;;  %v711_v37 = vunpack.c.l.bf16 %v826_v23  ;;  %v796_v39 = vunpack.c.h.bf16 %v847_v30  ;;  %v679_v40 = vunpack.c.l.bf16 %v818_v26  ;;  %v795_v44 = vunpack.c.l.bf16 %v847_v30  ;;  %v172_v55 = vld [vmem:[#allocation2 + $0x18] sm:$0xff]  ;;  %v996_v26 = vld [vmem:[#allocation4 + $0x18] sm:$0xff]   ;;  %v997_v30 = vld [vmem:[#allocation4 + $0x10] sm:$0xff]  }
  0x2b   :  { %864 = vmatpush3.msra.mxu0 %v627_v41  ;;  %896 = vmatprep.subr.mxu1 %v724_v58  ;;  %v764_v41 = vunpack.c.h.bf16 %v839_v33  ;;  %v676_v46 = vunpack.c.h.bf16 %v817_v38  ;;  %v763_v47 = vunpack.c.l.bf16 %v839_v33  ;;  %v707_v48 = vunpack.c.l.bf16 %v825_v35 }
  0x2c   :  { %865 = vmatprep.subr.mxu0 %v656_v43  ;;  %897 = vmatpush3.msra.mxu1 %v692_v60  ;;  %v708_v43 = vunpack.c.h.bf16 %v825_v35  ;;  %v675_v50 = vunpack.c.l.bf16 %v817_v38  ;;  %v788_v58 = vunpack.c.h.bf16 %v845_v52  ;;  %v756_v60 = vunpack.c.h.bf16 %v837_v54 }
  0x2d   :  { %866 = vmatpush3.msra.mxu0 %v624_v45  ;;  %898 = vmatprep.subr.mxu1 %v723_v63  ;;  %v838_v45 = vld [vmem:[#allocation4 + $0x168] sm:$0xff]   ;;  %v787_v63 = vunpack.c.l.bf16 %v845_v52  ;;  %v784_v2 = vunpack.c.h.bf16 %v844_v61  ;;  %v751_v9 = vunpack.c.l.bf16 %v836_v0  ;;  %v775_v21 = vunpack.c.l.bf16 %v842_v12 }
  0x2e   :  { %867 = vmatprep.subr.mxu0 %v655_v49  ;;  %899 = vmatpush3.msra.mxu1 %v691_v3  ;;  %v792_v49 = vunpack.c.h.bf16 %v846_v42  ;;  %v760_v51 = vunpack.c.h.bf16 %v838_v45  ;;  %v1049_v3 = vmov 0.0   ;;  %v45_v33 = vlaneseq }
  0x2f   :  { %868 = vmatpush3.msra.mxu0 %v623_v53  ;;  %900 = vmatprep.subr.mxu1 %v720_v6  ;;  %v791_v53 = vunpack.c.l.bf16 %v846_v42  ;;  %v993_v6 = vld [vmem:[#allocation4 + $0x30] sm:$0xff]  }
  0x30   :  { %869 = vmatprep.subr.mxu0 %v652_v56  ;;  %901 = vmatpush3.msra.mxu1 %v688_v8  ;;  %v759_v56 = vunpack.c.l.bf16 %v838_v45  ;;  %v835_v8 = vld [vmem:[#allocation4 + $0x150] sm:$0xff]  }
  0x31   :  { %870 = vmatpush3.msra.mxu0 %v620_v59  ;;  %902 = vmatprep.subr.mxu1 %v719_v11  ;;  %v174_v59 = vld [vmem:[#allocation2 + $0x28] sm:$0xff]  ;;  %v748_v11 = vunpack.c.h.bf16 %v835_v8 }
  0x32   :  { %871 = vmatprep.subr.mxu0 %v651_v62  ;;  %903 = vmatpush3.msra.mxu1 %v687_v14  ;;  %v992_v62 = vld [vmem:[#allocation4 + $0x38] sm:$0xff]   ;;  %v779_v14 = vunpack.c.l.bf16 %v843_v5 }
  0x33   :  { %872 = vmatpush3.msra.mxu0 %v619_v1  ;;  %904 = vmatprep.subr.mxu1 %v716_v16  ;;  %v755_v1 = vunpack.c.l.bf16 %v837_v54  ;;  %v747_v16 = vunpack.c.l.bf16 %v835_v8  ;;  %v607_v54 = vld [vmem:[%s1110_s3 + $0x1] ss:$0 sm:$0xff] }
  0x34   :  { %873 = vmatprep.subr.mxu0 %v648_v4  ;;  %905 = vmatpush3.msra.mxu1 %v684_v19  ;;  %v752_v4 = vunpack.c.h.bf16 %v836_v0  ;;  %v841_v19 = vld [vmem:[#allocation4 + $0x180] sm:$0xff]  }
  0x35   :  { %874 = vmatpush3.msra.mxu0 %v616_v7  ;;  %906 = vmatprep.subr.mxu1 %v715_v22  ;;  %v783_v7 = vunpack.c.l.bf16 %v844_v61  ;;  %v833_v22 = vld [vmem:[#allocation4 + $0x140] sm:$0xff]  }
  0x36   :  { %875 = vmatprep.subr.mxu0 %v647_v10  ;;  %907 = vmatpush3.msra.mxu1 %v683_v25  ;;  %v780_v10 = vunpack.c.h.bf16 %v843_v5  ;;  %v740_v25 = vunpack.c.h.bf16 %v833_v22 }
  0x37   :  { %876 = vmatpush3.msra.mxu0 %v615_v13  ;;  %908 = vmatprep.subr.mxu1 %v712_v31  ;;  %v994_v13 = vld [vmem:[#allocation4 + $0x28] sm:$0xff]  }
  0x38   :  { %877 = vmatprep.subr.mxu0 %v644_v15  ;;  %909 = vmatpush3.msra.mxu1 %v680_v34  ;;  %v834_v15 = vld [vmem:[#allocation4 + $0x148] sm:$0xff]   ;;  %v46_v34 = vand.u32 127, %v45_v33 }
  0x39   :  { %878 = vmatpush3.msra.mxu0 %v612_v17  ;;  %910 = vmatprep.subr.mxu1 %v711_v37  ;;  %v776_v17 = vunpack.c.h.bf16 %v842_v12  ;;  %v744_v18 = vunpack.c.h.bf16 %v834_v15  ;;  %v743_v23 = vunpack.c.l.bf16 %v834_v15  ;;  %v998_v31 = vld [vmem:[#allocation4 + $0x8] sm:$0xff]  }
  0x3a   :  { %879 = vmatprep.subr.mxu0 %v643_v20  ;;  %911 = vmatpush3.msra.mxu1 %v679_v40  ;;  %v995_v20 = vld [vmem:[#allocation4 + $0x20] sm:$0xff]  }
  0x3b   :  { %880 = vmatpush3.msra.mxu0 %v611_v24  ;;  %912 = vmatprep.subr.mxu1 %v708_v43  ;;  %v772_v24 = vunpack.c.h.bf16 %v841_v19 }
  0x3c   :  { %919 = vmatprep.subr.mxu0 %v800_v27  ;;  %336 = vmatmul.mubr.f32.vlgmr.msra.gmra.mxu0 %v169_v28  ;;  %v771_v27 = vunpack.c.l.bf16 %v841_v19  ;;  %v739_v28 = vunpack.c.l.bf16 %v833_v22 }
  0x3d   :  { %920 = vmatpush3.msra.mxu0 %v768_v29  ;;  %913 = vmatpush3.msra.mxu1 %v676_v46  ;;  %v173_v29 = vld [vmem:[#allocation2 + $0x20] sm:$0xff] }
  0x3e   :  { %921 = vmatprep.subr.mxu0 %v799_v32  ;;  %914 = vmatprep.subr.mxu1 %v707_v48  ;;  %v999_v32 = vld [vmem:[#allocation4] sm:$0xff]   ;;  %v606_v48 = vld [vmem:[%s1110_s3] ss:$0 sm:$0xff] }
  0x3f   :  { %922 = vmatpush3.msra.mxu0 %v767_v36  ;;  %915 = vmatpush3.msra.mxu1 %v675_v50  ;;  %v1051_v36 = vmov 1.0|1.0  }
  0x40   :  { %923 = vmatprep.subr.mxu0 %v796_v39  ;;  %405 = vmatprep.mubr.f32.mxu1 %v172_v55 }
  0x41   :  { %924 = vmatpush3.msra.mxu0 %v764_v41  ;;  %406 = vmatmul.mubr.f32.vlgmr.msra.gmra.mxu1 %v171_v57 }
  0x42   :  { %925 = vmatprep.subr.mxu0 %v795_v44  ;;  %475 = vmatprep.mubr.f32.mxu0 %v174_v59 }
  0x43   :  { %926 = vmatpush3.msra.mxu0 %v763_v47  ;;  %963 = vmatprep.subr.bf16.mxu1 %v1049_v3 }
  0x44   :  { %927 = vmatprep.subr.mxu0 %v792_v49  ;;  %964 = vmatpush3.bf16.msra.mxu1 %v992_v62 }
  0x45   :  { %928 = vmatpush3.msra.mxu0 %v760_v51  ;;  %965 = vmatprep.subr.bf16.mxu1 %v1049_v3 }
  0x46   :  { %929 = vmatprep.subr.mxu0 %v791_v53  ;;  %979 = vmatprep.mubr.msk.bf16.mxu1 %vm1050_vm0, %v1049_v3 }
  0x47   :  { %930 = vmatpush3.msra.mxu0 %v759_v56 }
  0x48   :  { %931 = vmatprep.subr.mxu0 %v788_v58  ;;  %966 = vmatpush3.bf16.msra.mxu1 %v993_v6  ;;  %v608_v58 = vld [vmem:[%s1110_s3 + $0x2] ss:$0 sm:$0xff] }
  0x49   :  { %932 = vmatpush3.msra.mxu0 %v756_v60  ;;  %967 = vmatprep.subr.bf16.mxu1 %v1049_v3 }
  0x4a   :  { %933 = vmatprep.subr.mxu0 %v787_v63 }
  0x4b   :  { %934 = vmatpush3.msra.mxu0 %v755_v1 }
  0x4c   :  { %935 = vmatprep.subr.mxu0 %v784_v2  ;;  %968 = vmatpush3.bf16.msra.mxu1 %v994_v13 }
  0x4d   :  { %936 = vmatpush3.msra.mxu0 %v752_v4  ;;  %969 = vmatprep.subr.bf16.mxu1 %v1049_v3 }
  0x4e   :  { %937 = vmatprep.subr.mxu0 %v783_v7 }
  0x4f   :  { %938 = vmatpush3.msra.mxu0 %v751_v9 }
  0x50   :  { %939 = vmatprep.subr.mxu0 %v780_v10  ;;  %970 = vmatpush3.bf16.msra.mxu1 %v995_v20 }
  0x51   :  { %940 = vmatpush3.msra.mxu0 %v748_v11  ;;  %971 = vmatprep.subr.bf16.mxu1 %v1049_v3 }
  0x52   :  { %941 = vmatprep.subr.mxu0 %v779_v14 }
  0x53   :  { %942 = vmatpush3.msra.mxu0 %v747_v16 }
  0x54   :  { %943 = vmatprep.subr.mxu0 %v776_v17  ;;  %972 = vmatpush3.bf16.msra.mxu1 %v996_v26 }
  0x55   :  { %944 = vmatpush3.msra.mxu0 %v744_v18  ;;  %973 = vmatprep.subr.bf16.mxu1 %v1049_v3 }
  0x56   :  { %945 = vmatprep.subr.mxu0 %v775_v21 }
  0x57   :  { %946 = vmatpush3.msra.mxu0 %v743_v23 }
  0x58   :  { %947 = vmatprep.subr.mxu0 %v772_v24  ;;  %974 = vmatpush3.bf16.msra.mxu1 %v997_v30 }
  0x59   :  { %948 = vmatpush3.msra.mxu0 %v740_v25  ;;  %975 = vmatprep.subr.bf16.mxu1 %v1049_v3 }
  0x5a   :  { %949 = vmatprep.subr.mxu0 %v771_v27 }
  0x5b   :  { %950 = vmatpush3.msra.mxu0 %v739_v28 }
  0x5c   :  { %476 = vmatmul.mubr.f32.vlgmr.msra.gmra.mxu0 %v173_v29  ;;  %976 = vmatpush3.bf16.msra.mxu1 %v998_v31 }
  0x5d   :  { %977 = vmatprep.subr.bf16.mxu1 %v1049_v3 }
  0x60   :  { %978 = vmatpush3.bf16.msra.mxu1 %v999_v32 }
  0x96   :  { %v49_v35 = vpop.permute.xlu0 %48 }
  0x97   :  { %vm50_vm1 = vcmp.eq.s32.totalorder %v46_v34, %v49_v35 }
  0x98   :  { %vm604_vm2 = vmpackc.low %vm50_vm1, %vm50_vm1 }
  0x99   :  { %980 = vmatmul.mubr.msk.bf16.vlgmr.msra.gmra.mxu1 %vm604_vm2, %v1051_v36 }
  0xfc   :  { %v881_v37 = vpop.f32.mrf.mxu0 }
  0xfe   :  { %v882_v38 = vpop.f32.mrf.mxu0 }
  0xff   :  { %v883_v42 = vadd.f32 %v882_v38, %v881_v37 }
 0x101   :  { %v916_v39 = vpop.f32.mrf.mxu1 }
 0x103   :  { %v917_v40 = vpop.f32.mrf.mxu1 }
 0x104   :  { %v918_v43 = vadd.f32 %v917_v40, %v916_v39 }
 0x106   :  { %v408_v45 = vadd.f32 %v918_v43, %v883_v42 }
 0x11c   :  { %v951_v41 = vpop.f32.mrf.mxu0 }
 0x11e   :  { %v952_v44 = vpop.f32.mrf.mxu0 }
 0x11f   :  { %v953_v46 = vadd.f32 %v952_v44, %v951_v41 }
 0x121   :  { %v478_v47 = vadd.f32 %v953_v46, %v408_v45 }
 0x159   :  { %v563_v49 = vpop.f32.mrf.mxu1 }
 0x15a   :  { %v564_v50 = vadd.f32 %v563_v49, %v478_v47 }
 0x15b   :  { %v981_v51 = vpop.f32.mrf.mxu1 }
 0x15c   :  { %v573_v52 = vadd.f32 %v606_v48, %v564_v50 }
 0x15d   :  { %v566_v53 = vpop.f32.mrf.mxu1 }
 0x15e   :  { %v574_v55 = vmax.f32 %v573_v52, 0.0 }
 0x15f   :  { %v982_v56 = vpop.f32.mrf.mxu1 }
 0x160   :  { %v579_v57 = vmul.f32 %v607_v54, %v574_v55 }
 0x162   :  { %580 = vadd.xlane.f32.xlu0 %v579_v57 }
 0x1eb   :  { %v581_v59 = vpop.xlane.xlu0 %580 }
 0x1ec   :  { %v586_v60 = vadd.f32 %v608_v58, %v581_v59 }
 0x1ee   :  { %588 = vst.msk [vmem:[%s1111_s4] sm:$0xff] %vm587_vm3, %v586_v60 }
 0x1ef   :  { %593 = vsyncpa [#allocation3], 1 }
 0x1f0   :  { %594 = vsyncpa [#allocation5], 1 }

</bundles_post_ra>
